<compile_context>
chip_gen: v7x
topology: tpu7x:2x2x1
jax: 0.10.0
libtpu: 0.0.40
codegen_flags: <defaults>
</compile_context>

<pallas_src>
import functools

import jax
import jax.numpy as jnp
from jax.experimental import pallas as pl
from jax.experimental.pallas import tpu as pltpu

SE3_DIM = 12  # 6 (start se3) + 6 (end se3)

_MAX_ONEHOT_BYTES = 16 << 20  # cap on the materialized (bm, N) one-hot temp


def _round_up(x, m):
    return ((x + m - 1) // m) * m


def _ceil_div(a, b):
    return -(-a // b)


def _choose_tiling(B, N, block_b):
    """Pick (bm, steps): bm multiple of 128, grid=(steps,), steps * bm >= B."""
    bm_cap = _round_up(max(block_b, 128), 128)
    # Keep the one-hot temp (bm * N * 4 B) bounded so large pose tables don't
    # blow scoped VMEM (binds at ~half the N on v7x's 64 MiB physical VMEM).
    onehot_cap = max(128, (_MAX_ONEHOT_BYTES // (4 * max(N, 1))) // 128 * 128)
    bm_cap = min(bm_cap, onehot_cap)
    if B <= bm_cap:
        return _round_up(B, 128), 1
    steps = _ceil_div(B, bm_cap)
    steps += steps % 2            # even, balanced steps -> dual-TC on v7x
    bm = _round_up(_ceil_div(B, steps), 128)
    return bm, steps


# ----------------------------------------------------------------------------
# Pallas kernel: transposed one-hot MXU gather   out_T[:, b] = table_T[:, idx[b]]
# ----------------------------------------------------------------------------
def _onehot_gather_kernel_t(idx_ref, table_t_ref, out_ref):
    # idx_ref    : VMEM (1, BM)  int32    -- indices for this output tile
    # table_t_ref: VMEM (D, N)   float32  -- whole table (transposed), resident
    # out_ref    : VMEM (D, BM)  float32  -- lane-dense full-tile store
    n = table_t_ref.shape[1]
    bm = idx_ref.shape[1]

    idx = idx_ref[...]                                          # (1, BM)
    row_ids = jax.lax.broadcasted_iota(jnp.int32, (n, bm), 0)   # (N, BM)
    # Out-of-range / padded indices match no row -> all-zero one-hot column,
    # so no index value can ever cause an OOB VMEM access.
    onehot_t = (row_ids == idx).astype(table_t_ref.dtype)       # (N, BM)

    out_ref[...] = jnp.dot(
        table_t_ref[...],
        onehot_t,
        preferred_element_type=jnp.float32,
        precision=jax.lax.Precision.HIGHEST,   # exact f32 row selection
    ).astype(out_ref.dtype)


@functools.partial(jax.jit, static_argnames=("block_b",))
def deblur_optimizer_forward(se3_table, indices, *, block_b=2048):
    """Pallas equivalent of DeblurOptimizer.forward: se3_table[indices, :]."""
    N, D = se3_table.shape
    B = indices.shape[0]

    # torch-style negative indices wrap around.
    idx = indices.astype(jnp.int32)
    idx = jnp.where(idx < 0, idx + N, idx)

    bm, steps = _choose_tiling(B, N, block_b)
    b_pad = bm * steps

    # Indices as a lane-major row (1, b_pad); padded tail indices are 0 ->
    # harmlessly gather row 0 and are removed by the final [:B] slice below.
    # Do not change that final slice without revisiting this.
    idx_row = jnp.zeros((1, b_pad), jnp.int32).at[0, :B].set(idx)

    # Table at its natural size, transposed to (D, N) so the kernel output is
    # lane-dense. No padding copy: full-array blocks are exempt from (8,128).
    table_t = se3_table.T                                        # (D, N)

    # Explicit VMEM budget (one-hot temp + double-buffered idx/out tiles +
    # resident table) -- v5e's default scoped limit is only 16 MiB; 48 MiB
    # stays under v7x's 64 MiB physical VMEM.
    onehot_bytes = 4 * bm * _round_up(N, 8)
    io_bytes = 2 * (4 * bm + 4 * D * bm) + 4 * D * _round_up(N, 128)
    vmem_limit = int(min(48 << 20,
                         max(32 << 20, 2 * onehot_bytes + io_bytes + (2 << 20))))

    out_t = pl.pallas_call(
        _onehot_gather_kernel_t,
        out_shape=jax.ShapeDtypeStruct((D, b_pad), se3_table.dtype),
        grid=(steps,),
        in_specs=[
            pl.BlockSpec((1, bm), lambda i: (0, i)),     # index row tile
            pl.BlockSpec((D, N), lambda i: (0, 0)),      # whole table, resident
        ],
        out_specs=pl.BlockSpec((D, bm), lambda i: (0, i)),
        compiler_params=pltpu.CompilerParams(
            dimension_semantics=("parallel",),           # dual-TC on v7x
            vmem_limit_bytes=vmem_limit),
    )(idx_row, table_t)

    return out_t[:, :B].T                                # (B, 12)


# ----------------------------------------------------------------------------
# Parameter construction glue (matches __init__ semantics, plain JAX,
# one-time init-path work -- intentionally NOT a kernel).
# ----------------------------------------------------------------------------
def _skew(w):
    z = jnp.zeros_like(w[..., 0])
    return jnp.stack([
        jnp.stack([z, -w[..., 2], w[..., 1]], -1),
        jnp.stack([w[..., 2], z, -w[..., 0]], -1),
        jnp.stack([-w[..., 1], w[..., 0], z], -1),
    ], -2)


def SE3_to_se3_N(poses):
    """SE3 log map.  poses: (N, 3, 4) -> se3: (N, 6) = [w (rot), u (trans)]."""
    R = poses[..., :3, :3]
    t = poses[..., :3, 3]
    tr = R[..., 0, 0] + R[..., 1, 1] + R[..., 2, 2]
    cos_t = jnp.clip((tr - 1.0) * 0.5, -1.0, 1.0)
    theta = jnp.arccos(cos_t)
    sin_t = jnp.sin(theta)
    small = theta < 1e-6

    vee = jnp.stack([R[..., 2, 1] - R[..., 1, 2],
                     R[..., 0, 2] - R[..., 2, 0],
                     R[..., 1, 0] - R[..., 0, 1]], -1)
    factor = jnp.where(small, 0.5, theta / jnp.where(small, 1.0, 2.0 * sin_t))
    w = vee * factor[..., None]

    W = _skew(w)
    W2 = jnp.einsum('nij,njk->nik', W, W)
    theta_sq = jnp.where(small, 1.0, theta * theta)
    denom = 2.0 * jnp.where(small, 1.0, 1.0 - cos_t)
    coeff = jnp.where(small, 1.0 / 12.0,
                      (1.0 - theta * sin_t / denom) / theta_sq)
    V_inv = jnp.eye(3, dtype=poses.dtype) - 0.5 * W + coeff[..., None, None] * W2
    u = jnp.einsum('nij,nj->ni', V_inv, t)
    return jnp.concatenate([w, u], -1)


def init_deblur_optimizer(poses, key):
    """Builds the (N, 12) se3 parameter exactly like DeblurOptimizer.__init__."""
    poses_start_se3 = SE3_to_se3_N(poses[:, :3, :4])
    poses_end_se3 = poses_start_se3
    low, high = 1e-4, 5e-3
    rand = (high - low) * jax.random.uniform(
        key, (poses_start_se3.shape[0], 6), dtype=poses_start_se3.dtype) + low
    poses_start_se3 = poses_start_se3 + rand
    return jnp.concatenate([poses_start_se3, poses_end_se3], -1)


# ----------------------------------------------------------------------------
def _make_example_poses(n):
    """Deterministic small camera poses: rotation about z + translation."""
    i = jnp.arange(n, dtype=jnp.float32)
    ang = 0.15 * i
    c, s = jnp.cos(ang), jnp.sin(ang)
    z = jnp.zeros_like(ang)
    o = jnp.ones_like(ang)
    R = jnp.stack([
        jnp.stack([c, -s, z], -1),
        jnp.stack([s, c, z], -1),
        jnp.stack([z, z, o], -1),
    ], -2)                                        # (N, 3, 3)
    t = jnp.stack([0.02 * i, -0.01 * i, 0.05 * o], -1)[..., None]  # (N, 3, 1)
    bottom = jnp.tile(jnp.array([[0.0, 0.0, 0.0, 1.0]]), (n, 1))[:, None, :]
    return jnp.concatenate([jnp.concatenate([R, t], -1), bottom], -2)  # (N, 4, 4)


if __name__ == "__main__":
    key = jax.random.PRNGKey(0)

    num_poses = 8
    poses = _make_example_poses(num_poses)                 # (8, 4, 4) float32
    se3_param = init_deblur_optimizer(poses, key)          # (8, 12)   float32

    # Small forward: whole batch gathered in a single grid step.
    indices = jnp.array([3, 0, 5, 1, 7, 2], dtype=jnp.int32)   # (6,)
    out = jax.block_until_ready(deblur_optimizer_forward(se3_param, indices))
    ref = jnp.take(se3_param, indices, axis=0)
    assert out.shape == (indices.shape[0], SE3_DIM)
    assert jnp.allclose(out, ref, atol=1e-6, rtol=1e-5), "gather mismatch (small)"

    # Larger batch exercising the multi-tile path: block_b=128, B=300 ->
    # 4 balanced grid steps of 128 rows (even count -> dual-TC on v7x).
    indices2 = jax.random.randint(jax.random.PRNGKey(1), (300,), 0, num_poses,
                                  dtype=jnp.int32)
    out2 = jax.block_until_ready(
        deblur_optimizer_forward(se3_param, indices2, block_b=128))
    ref2 = jnp.take(se3_param, indices2, axis=0)
    assert out2.shape == (300, SE3_DIM)
    assert jnp.allclose(out2, ref2, atol=1e-6, rtol=1e-5), "gather mismatch (tiled)"

    print("KERNEL_OK")
</pallas_src>

<mosaic_0001>
module attributes {stable_mosaic.version = 11 : i64} {
  func.func @_onehot_gather_kernel_t(%arg0: i32, %arg1: memref<1x128xi32, #tpu.memory_space<vmem>>, %arg2: memref<12x8xf32, #tpu.memory_space<vmem>>, %arg3: memref<12x128xf32, #tpu.memory_space<vmem>>) attributes {dimension_semantics = [#tpu.dimension_semantics<parallel>], iteration_bounds = array<i64: 1>, scalar_prefetch = 0 : i64, scratch_operands = 0 : i64, tpu.core_type = #tpu.core_type<tc>, window_params = [{transform_indices = @transform_0, window_bounds = array<i64: 1, 128>}, {pipeline_mode = #tpu.pipeline_mode<synchronous>, transform_indices = @transform_1, window_bounds = array<i64: 12, 8>}, {transform_indices = @transform_2, window_bounds = array<i64: 12, 128>}]} {
    %c0 = arith.constant 0 : index
    %c0_0 = arith.constant 0 : index
    %0 = vector.load %arg1[%c0, %c0_0] : memref<1x128xi32, #tpu.memory_space<vmem>>, vector<1x128xi32>
    %1 = tpu.iota {dimensions = array<i32: 0>} : vector<8x128xi32>
    %2 = vector.broadcast %0 : vector<1x128xi32> to vector<8x128xi32>
    %3 = arith.cmpi eq, %1, %2 : vector<8x128xi32>
    %4 = arith.extui %3 : vector<8x128xi1> to vector<8x128xi32>
    %5 = arith.sitofp %4 : vector<8x128xi32> to vector<8x128xf32>
    %c0_1 = arith.constant 0 : index
    %c0_2 = arith.constant 0 : index
    %6 = vector.load %arg2[%c0_1, %c0_2] : memref<12x8xf32, #tpu.memory_space<vmem>>, vector<12x8xf32>
    %cst = arith.constant dense<0.000000e+00> : vector<12x128xf32>
    %7 = tpu.matmul %6, %5, %cst {dimension_numbers = #tpu.dot_dimension_numbers<[1], [0], [0], [1], [0, 0, 1, 1], [], []>, precision = #tpu.contract_precision<fp32>} : vector<12x8xf32>, vector<8x128xf32>, vector<12x128xf32> -> vector<12x128xf32>
    %c0_3 = arith.constant 0 : index
    %c0_4 = arith.constant 0 : index
    %8 = vector.load %arg3[%c0_3, %c0_4] : memref<12x128xf32, #tpu.memory_space<vmem>>, vector<12x128xf32>
    tpu.vector_store %arg3[%c0_3, %c0_4], %7 {strides = array<i32>} : memref<12x128xf32, #tpu.memory_space<vmem>>, vector<12x128xf32>,
    return
  }
  func.func @transform_0(%arg0: i32) -> (i32, i32) {
    %c0_i32 = arith.constant 0 : i32
    %c0_i32_0 = arith.constant 0 : i32
    return %c0_i32, %arg0 : i32, i32
  }
  func.func @transform_1(%arg0: i32) -> (i32, i32) {
    %c0_i32 = arith.constant 0 : i32
    %c0_i32_0 = arith.constant 0 : i32
    %c0_i32_1 = arith.constant 0 : i32
    return %c0_i32, %c0_i32_0 : i32, i32
  }
  func.func @transform_2(%arg0: i32) -> (i32, i32) {
    %c0_i32 = arith.constant 0 : i32
    %c0_i32_0 = arith.constant 0 : i32
    return %c0_i32, %arg0 : i32, i32
  }
}

</mosaic_0001>

<bundles_post_ra>
// kernel: deblur_optimizer_forward.1
= control target key start
LH: loop header
LB: loop body
LE: loop exit
PB: predicated region body
PF: predicated region fallthrough
CT: control target
= control target key end

     0   :  { %v12_v0 = vlaneseq  ;;  %vm23_vm0 = vcmask 64512   ;;  %v590_v10 = vmov 1.0   ;;  %v591_v13 = vmov 0.0   ;;  %s640_s0 = inlined_call_operand.vmem [shape: s32[1,128], index: 0, kind: input, shape index: {}]   ;;  %s641_s1 = inlined_call_operand.vmem [shape: f32[12,8], index: 1, kind: input, shape index: {}]   ;;  %s642_s2 = inlined_call_operand.vmem [shape: f32[12,128], index: 2, kind: output, shape index: {}]  }
   0x1   :  { %v525_v1 = vld [vmem:[%s640_s0] ss:$0 sm:$0xff]  ;;  %v22_v3 = vld [vmem:[%s641_s1 + $0x8] sm:$0xf] }
   0x2   :  { %v21_v2 = vld [vmem:[%s641_s1] sm:$0xff]  ;;  %v13_v4 = vshrl.u32 %v12_v0, 7  ;;  %v28_v6 = vsel %vm23_vm0, %v22_v3, 0 }
   0x3   :  { %v25_v5 = vsel %vm23_vm0, %v21_v2, 0  ;;  %v106_v8 = vand.u32 4294901760, %v28_v6 }
   0x4   :  { %v96_v7 = vand.u32 4294901760, %v25_v5  ;;  %vm616_vm1 = vcmp.eq.s32.totalorder %v13_v4, %v525_v1 }
   0x5   :  { %563 = vmatprep.subr.msk.mxu0 %vm616_vm1, %v590_v10  ;;  %v107_v12 = vsub.f32 %v28_v6, %v106_v8  ;;  %548 = vmatprep.subr.msk.mxu1 %vm616_vm1, %v590_v10  ;;  %v526_v14 = vsel %vm616_vm1, 1.0, %v591_v13 }
   0x6   :  { %v97_v11 = vsub.f32 %v25_v5, %v96_v7  ;;  %564 = vmatpush3.msk.msra.mxu0 %vm616_vm1, %v590_v10  ;;  %549 = vmatpush3.msk.msra.mxu1 %vm616_vm1, %v590_v10  ;;  %v118_v15 = vsub.f32 %v526_v14, %v526_v14 }
   0x7   :  { %v108_v17 = vand.u32 4294901760, %v107_v12 }
   0x8   :  { %v98_v16 = vand.u32 4294901760, %v97_v11  ;;  %v119_v18 = vand.u32 4294901760, %v118_v15 }
   0x9   :  { %v109_v20 = vsub.f32 %v107_v12, %v108_v17 }
   0xa   :  { %565 = vmatprep.mubr.f32.mxu0 %v98_v16  ;;  %v99_v19 = vsub.f32 %v97_v11, %v98_v16  ;;  %v120_v21 = vsub.f32 %v118_v15, %v119_v18  ;;  %568 = vmatprep.subr.mxu0 %v119_v18 }
   0xb   :  { %566 = vmatmul.mubr.f32.vlgmr.msra.gmra.mrb[0].mxu0 %v108_v17  ;;  %v110_v23 = vand.u32 4294901760, %v109_v20 }
   0xc   :  { %v100_v22 = vand.u32 4294901760, %v99_v19  ;;  %569 = vmatpush3.msra.mxu0 %v119_v18  ;;  %570 = vmatprep.mubr.f32.mxu0 %v96_v7  ;;  %v121_v24 = vand.u32 4294901760, %v120_v21 }
   0xd   :  { %573 = vmatprep.subr.msk.mxu0 %vm616_vm1, %v590_v10 }
   0xe   :  { %550 = vmatprep.mubr.f32.mxu1 %v100_v22  ;;  %553 = vmatprep.subr.mxu1 %v121_v24 }
   0xf   :  { %551 = vmatmul.mubr.f32.vlgmr.msra.gmra.mrb[0].mxu1 %v110_v23 }
  0x10   :  { %554 = vmatpush3.msra.mxu1 %v121_v24  ;;  %555 = vmatprep.mubr.f32.mxu1 %v96_v7 }
  0x11   :  { %558 = vmatprep.subr.mxu1 %v118_v15 }
  0x13   :  { %571 = vmatmul.mubr.f32.vlgmr.msra.gmra.mrb[0].mxu0 %v106_v8 }
  0x14   :  { %574 = vmatpush3.msk.msra.mxu0 %vm616_vm1, %v590_v10  ;;  %575 = vmatprep.mubr.f32.mxu0 %v96_v7 }
  0x17   :  { %556 = vmatmul.mubr.f32.vlgmr.msra.gmra.mrb[0].mxu1 %v106_v8 }
  0x18   :  { %559 = vmatpush3.msra.mxu1 %v118_v15  ;;  %560 = vmatprep.mubr.f32.mxu1 %v97_v11 }
  0x1b   :  { %576 = vmatmul.mubr.f32.vlgmr.msra.gmra.mrb[0].mxu0 %v106_v8 }
  0x1f   :  { %561 = vmatmul.mubr.f32.vlgmr.msra.gmra.mrb[0].mxu1 %v107_v12 }
  0xee   :  { %v577_v25 = vpop.f32.mrb[0].mxu0 }
  0xef   :  { %v509_v26 = vpop.f32.mrb[1].mxu0 }
  0xf2   :  { %v562_v27 = vpop.f32.mrb[0].mxu1 }
  0xf3   :  { %v578_v28 = vadd.f32 %v577_v25, %v562_v27  ;;  %v268_v29 = vpop.f32.mrb[1].mxu1 }
  0xf4   :  { %v579_v30 = vadd.f32 %v509_v26, %v268_v29 }
  0xf5   :  { %520 = vst [vmem:[%s642_s2 + $0x8] sm:$0xf] %v578_v28 }
  0xf6   :  { %519 = vst [vmem:[%s642_s2] sm:$0xff] %v579_v30 }

</bundles_post_ra>
